<compile_context>
chip_gen: v5e
topology: v5e:2x2
jax: 0.10.0
libtpu: 0.0.40
codegen_flags: <defaults>
</compile_context>

<pallas_src>
import math
import jax
import jax.numpy as jnp
from jax.experimental import pallas as pl
from jax.experimental.pallas import tpu as pltpu


def _round_up(x, m):
    return ((x + m - 1) // m) * m


_VMEM_LIMIT = 32 * 1024 * 1024  # safe scoped-VMEM budget on v5e/v6e/v7x


# --------------------------------------------------------------------------
# Stage 1: support = X @ W   (computed once, row-tiled, lane-dense output)
# --------------------------------------------------------------------------
def _support_kernel(x_ref, w_ref, o_ref):
    o_ref[...] = jnp.dot(
        x_ref[...], w_ref[...], preferred_element_type=jnp.float32
    ).astype(o_ref.dtype)


def _compute_support(x_pad, w_pad, tile, out_dtype):
    n_pad, f_in = x_pad.shape
    f_out_pad = w_pad.shape[1]
    flops = 2 * n_pad * f_in * f_out_pad
    bytes_accessed = (
        x_pad.size * x_pad.dtype.itemsize
        + w_pad.size * w_pad.dtype.itemsize
        + n_pad * f_out_pad * jnp.dtype(out_dtype).itemsize
    )
    return pl.pallas_call(
        _support_kernel,
        out_shape=jax.ShapeDtypeStruct((n_pad, f_out_pad), out_dtype),
        grid_spec=pltpu.PrefetchScalarGridSpec(
            num_scalar_prefetch=0,
            grid=(n_pad // tile,),
            in_specs=[
                pl.BlockSpec((tile, f_in), lambda i: (i, 0)),
                pl.BlockSpec((f_in, f_out_pad), lambda i: (0, 0)),
            ],
            out_specs=pl.BlockSpec((tile, f_out_pad), lambda i: (i, 0)),
        ),
        compiler_params=pltpu.CompilerParams(
            dimension_semantics=("parallel",),
            vmem_limit_bytes=_VMEM_LIMIT,
        ),
        cost_estimate=pl.CostEstimate(
            flops=flops, transcendentals=0, bytes_accessed=bytes_accessed
        ),
    )(x_pad, w_pad)


# --------------------------------------------------------------------------
# Stage 2: out = A @ support + b   (2-D grid, f32 accumulator, bias at k==last)
# --------------------------------------------------------------------------
def _aggregate_kernel(adj_ref, sup_ref, b_ref, o_ref, acc_ref):
    @pl.when(pl.program_id(1) == 0)
    def _():
        acc_ref[...] = jnp.zeros_like(acc_ref)

    acc_ref[...] += jnp.dot(
        adj_ref[...], sup_ref[...], preferred_element_type=jnp.float32
    )

    @pl.when(pl.program_id(1) == pl.num_programs(1) - 1)
    def _():
        o_ref[...] = (acc_ref[...] + b_ref[...]).astype(o_ref.dtype)


def graph_convolution(x, adj, weight, bias=None, *, use_bf16=False, tile=None):
    """Pallas GCN layer forward.

    x:      (N, F_in)     float32
    adj:    (N, N)        float32 (dense)
    weight: (F_in, F_out) float32
    bias:   (F_out,)      float32 or None
    use_bf16: feed the MXU bf16 inputs (f32 accumulation kept).
    returns (N, F_out) float32
    """
    x = jnp.asarray(x, jnp.float32)
    adj = jnp.asarray(adj, jnp.float32)
    weight = jnp.asarray(weight, jnp.float32)

    n, f_in = x.shape
    f_out = weight.shape[1]

    # ---- tiled / padded sizes (lane-dense output, 128-aligned tiles) -------
    f_out_pad = _round_up(f_out, 128)
    if tile is None:
        tile = min(512, _round_up(max(n, 8), 128))
    assert tile % 128 == 0, "tile must be a multiple of 128"
    n_pad = _round_up(n, tile)

    mxu_dtype = jnp.bfloat16 if use_bf16 else jnp.float32

    # ---- zero-pad outside the kernel (exact; sliced off at the end) --------
    x_pad = jnp.pad(x, ((0, n_pad - n), (0, 0))).astype(mxu_dtype)
    adj_pad = jnp.pad(adj, ((0, n_pad - n), (0, n_pad - n))).astype(mxu_dtype)
    w_pad = jnp.pad(weight, ((0, 0), (0, f_out_pad - f_out))).astype(mxu_dtype)
    if bias is not None:
        b_pad = jnp.pad(jnp.asarray(bias, jnp.float32), (0, f_out_pad - f_out))
    else:
        b_pad = jnp.zeros((f_out_pad,), jnp.float32)
    b_pad = b_pad.reshape(1, f_out_pad)

    # ---- stage 1: support computed once ------------------------------------
    support = _compute_support(x_pad, w_pad, tile, mxu_dtype)

    # ---- stage 2: tiled A @ support + b ------------------------------------
    grid = (n_pad // tile, n_pad // tile)  # (row tiles, reduction tiles)
    flops = 2 * n_pad * n_pad * f_out_pad
    bytes_accessed = (
        adj_pad.size * adj_pad.dtype.itemsize
        + support.size * support.dtype.itemsize
        + n_pad * f_out_pad * 4
        + f_out_pad * 4
    )

    out_pad = pl.pallas_call(
        _aggregate_kernel,
        out_shape=jax.ShapeDtypeStruct((n_pad, f_out_pad), jnp.float32),
        grid_spec=pltpu.PrefetchScalarGridSpec(
            num_scalar_prefetch=0,
            grid=grid,
            in_specs=[
                pl.BlockSpec((tile, tile), lambda i, k: (i, k)),        # adj
                pl.BlockSpec((tile, f_out_pad), lambda i, k: (k, 0)),   # support
                pl.BlockSpec((1, f_out_pad), lambda i, k: (0, 0)),      # bias
            ],
            out_specs=pl.BlockSpec((tile, f_out_pad), lambda i, k: (i, 0)),
            scratch_shapes=[pltpu.VMEM((tile, f_out_pad), jnp.float32)],
        ),
        compiler_params=pltpu.CompilerParams(
            dimension_semantics=("parallel", "arbitrary"),
            vmem_limit_bytes=_VMEM_LIMIT,
        ),
        cost_estimate=pl.CostEstimate(
            flops=flops, transcendentals=0, bytes_accessed=bytes_accessed
        ),
    )(adj_pad, support, b_pad)

    return out_pad[:n, :f_out]


def init_gcn_params(key, in_features, out_features, bias=True):
    """Deterministic init mirroring GraphConvolution.reset_parameters:
    uniform(-stdv, stdv) with stdv = 1/sqrt(out_features)."""
    stdv = 1.0 / math.sqrt(out_features)
    kw, kb = jax.random.split(key)
    weight = jax.random.uniform(
        kw, (in_features, out_features), minval=-stdv, maxval=stdv, dtype=jnp.float32
    )
    b = None
    if bias:
        b = jax.random.uniform(
            kb, (out_features,), minval=-stdv, maxval=stdv, dtype=jnp.float32
        )
    return weight, b


def _reference(x, adj, weight, bias):
    s = jnp.dot(x, weight, precision=jax.lax.Precision.HIGHEST)
    o = jnp.dot(adj, s, precision=jax.lax.Precision.HIGHEST)
    return o if bias is None else o + bias[None, :]


if __name__ == "__main__":
    key = jax.random.PRNGKey(0)
    k_x, k_adj, k_p, k_x2, k_adj2 = jax.random.split(key, 5)

    IN_F, OUT_F = 8, 32
    weight, bias = init_gcn_params(k_p, IN_F, OUT_F, bias=True)

    # --- case 1: tiny demo shape (single tile after padding) ---------------
    N = 16
    x = jax.random.normal(k_x, (N, IN_F), dtype=jnp.float32)
    a = jax.random.uniform(k_adj, (N, N), dtype=jnp.float32)
    adj = (a + a.T) * 0.5
    adj = adj / jnp.sum(adj, axis=1, keepdims=True)

    out = jax.block_until_ready(graph_convolution(x, adj, weight, bias))
    ref = _reference(x, adj, weight, bias)
    assert out.shape == (N, OUT_F)
    assert jnp.allclose(out, ref, atol=1e-5, rtol=1e-5)

    # --- case 2: multi-tile grid (exercises the k-reduction accumulator) ----
    N2 = 384
    x2 = jax.random.normal(k_x2, (N2, IN_F), dtype=jnp.float32)
    a2 = jax.random.uniform(k_adj2, (N2, N2), dtype=jnp.float32)
    adj2 = (a2 + a2.T) * 0.5
    adj2 = adj2 / jnp.sum(adj2, axis=1, keepdims=True)

    out2 = jax.block_until_ready(
        graph_convolution(x2, adj2, weight, bias, tile=128)
    )
    ref2 = _reference(x2, adj2, weight, bias)
    assert jnp.allclose(out2, ref2, atol=1e-4, rtol=1e-4)

    # --- case 3: no-bias + bf16 MXU inputs (f32 accumulate, loose tol) ------
    out3 = jax.block_until_ready(
        graph_convolution(x2, adj2, weight, None, use_bf16=True, tile=128)
    )
    ref3 = _reference(x2, adj2, weight, None)
    assert jnp.allclose(out3, ref3, atol=3e-2, rtol=3e-2)

    print("KERNEL_OK")
</pallas_src>

<mosaic_0001>
module attributes {stable_mosaic.version = 11 : i64} {
  func.func @_support_kernel(%arg0: i32, %arg1: memref<128x8xf32, #tpu.memory_space<vmem>>, %arg2: memref<8x128xf32, #tpu.memory_space<vmem>>, %arg3: memref<128x128xf32, #tpu.memory_space<vmem>>) attributes {dimension_semantics = [#tpu.dimension_semantics<parallel>], iteration_bounds = array<i64: 1>, scalar_prefetch = 0 : i64, scratch_operands = 0 : i64, tpu.core_type = #tpu.core_type<tc>, window_params = [{transform_indices = @transform_0, window_bounds = array<i64: 128, 8>}, {pipeline_mode = #tpu.pipeline_mode<synchronous>, transform_indices = @transform_1, window_bounds = array<i64: 8, 128>}, {transform_indices = @transform_2, window_bounds = array<i64: 128, 128>}]} {
    %c0 = arith.constant 0 : index
    %c0_0 = arith.constant 0 : index
    %0 = vector.load %arg1[%c0, %c0_0] : memref<128x8xf32, #tpu.memory_space<vmem>>, vector<128x8xf32>
    %c0_1 = arith.constant 0 : index
    %c0_2 = arith.constant 0 : index
    %1 = vector.load %arg2[%c0_1, %c0_2] : memref<8x128xf32, #tpu.memory_space<vmem>>, vector<8x128xf32>
    %cst = arith.constant dense<0.000000e+00> : vector<128x128xf32>
    %2 = tpu.matmul %0, %1, %cst {dimension_numbers = #tpu.dot_dimension_numbers<[1], [0], [0], [1], [0, 0, 1, 1], [], []>} : vector<128x8xf32>, vector<8x128xf32>, vector<128x128xf32> -> vector<128x128xf32>
    %c0_3 = arith.constant 0 : index
    %c0_4 = arith.constant 0 : index
    %3 = vector.load %arg3[%c0_3, %c0_4] : memref<128x128xf32, #tpu.memory_space<vmem>>, vector<128x128xf32>
    tpu.vector_store %arg3[%c0_3, %c0_4], %2 {strides = array<i32>} : memref<128x128xf32, #tpu.memory_space<vmem>>, vector<128x128xf32>,
    return
  }
  func.func @transform_0(%arg0: i32) -> (i32, i32) {
    %c0_i32 = arith.constant 0 : i32
    %c0_i32_0 = arith.constant 0 : i32
    return %arg0, %c0_i32 : i32, i32
  }
  func.func @transform_1(%arg0: i32) -> (i32, i32) {
    %c0_i32 = arith.constant 0 : i32
    %c0_i32_0 = arith.constant 0 : i32
    %c0_i32_1 = arith.constant 0 : i32
    return %c0_i32, %c0_i32_0 : i32, i32
  }
  func.func @transform_2(%arg0: i32) -> (i32, i32) {
    %c0_i32 = arith.constant 0 : i32
    %c0_i32_0 = arith.constant 0 : i32
    return %arg0, %c0_i32 : i32, i32
  }
}

</mosaic_0001>

<bundles_post_ra>
// kernel: tpu_custom_call.1
= control target key start
LH: loop header
LB: loop body
LE: loop exit
PB: predicated region body
PF: predicated region fallthrough
CT: control target
= control target key end

     0   :  { %vm29_vm0 = vcmask 64512   ;;  %s313_s0 = inlined_call_operand.vmem [shape: f32[128,8], index: 0, kind: input, shape index: {}]   ;;  %s314_s1 = inlined_call_operand.vmem [shape: f32[8,128], index: 1, kind: input, shape index: {}]   ;;  %s315_s2 = inlined_call_operand.hbm [shape: f32[128,128], index: 2, kind: output, shape index: {}]  }
   0x1   :  { %v28_v0 = vld [vmem:[%s314_s1] sm:$0xff] }
   0x2   :  { %v20_v1 = vld [vmem:[%s313_s0 + $0x40] sm:$0xff]  ;;  %194 = vmatpush.msra.mxu2 %v28_v0  ;;  %195 = vmatpush.msra.mxu3 %v28_v0 }
   0x3   :  { %v24_v2 = vld [vmem:[%s313_s0 + $0x60] sm:$0xff]  ;;  %185 = vmatmul.msk.f32.vlgmr.msra.gmra.mxu2 %vm29_vm0, %v20_v1  ;;  %93 = vmatpush.msra.mxu0 %v28_v0 }
   0x4   :  { %v12_v3 = vld [vmem:[%s313_s0] sm:$0xff]  ;;  %189 = vmatmul.msk.f32.vlgmr.msra.gmra.mxu3 %vm29_vm0, %v24_v2  ;;  %193 = vmatpush.msra.mxu1 %v28_v0 }
   0x5   :  { %v16_v4 = vld [vmem:[%s313_s0 + $0x20] sm:$0xff]  ;;  %177 = vmatmul.msk.f32.vlgmr.msra.gmra.mxu0 %vm29_vm0, %v12_v3 }
   0x6   :  { %181 = vmatmul.msk.f32.vlgmr.msra.gmra.mxu1 %vm29_vm0, %v16_v4 }
   0x7   :  { %7 = vsyncpa [#allocation3], 0  ;;  %v21_v5 = vld [vmem:[%s313_s0 + $0x48] sm:$0xff]  ;;  %v22_v9 = vld [vmem:[%s313_s0 + $0x50] sm:$0xff]  ;;  %s165_s17 = sshll.u32 %s315_s2, 4  ;;  %s226_s18 = smov 128   ;;  %s166_s17 = int_to_ptr.hbm [resolvable:$true] %s165_s17 }
   0x8   :  { %v25_v6 = vld [vmem:[%s313_s0 + $0x68] sm:$0xff]  ;;  %v26_v10 = vld [vmem:[%s313_s0 + $0x70] sm:$0xff]  ;;  %v23_v13 = vld [vmem:[%s313_s0 + $0x58] sm:$0xff]  ;;  %s227_s1 = smov 8  }
   0x9   :  { %v13_v7 = vld [vmem:[%s313_s0 + $0x8] sm:$0xff]  ;;  %v14_v11 = vld [vmem:[%s313_s0 + $0x10] sm:$0xff]  ;;  %v27_v14 = vld [vmem:[%s313_s0 + $0x78] sm:$0xff] }
   0xa   :  { %v17_v8 = vld [vmem:[%s313_s0 + $0x28] sm:$0xff]  ;;  %v18_v12 = vld [vmem:[%s313_s0 + $0x30] sm:$0xff]  ;;  %v15_v15 = vld [vmem:[%s313_s0 + $0x18] sm:$0xff] }
   0xb   :  { %186 = vmatmul.msk.f32.gmra.mxu2 %vm29_vm0, %v21_v5  ;;  %v19_v16 = vld [vmem:[%s313_s0 + $0x38] sm:$0xff]  ;;  %s225_s0 = smov [#allocation2]  }
   0xc   :  { %190 = vmatmul.msk.f32.gmra.mxu3 %vm29_vm0, %v25_v6  ;;  %s163_s14 = sshll.u32 %s225_s0, 4  ;;  %s164_s14 = int_to_ptr.vmem [resolvable:$true] %s163_s14 }
   0xd   :  { %178 = vmatmul.msk.f32.gmra.mxu0 %vm29_vm0, %v13_v7 }
   0xe   :  { %182 = vmatmul.msk.f32.gmra.mxu1 %vm29_vm0, %v17_v8 }
  0x13   :  { %187 = vmatmul.msk.f32.gmra.mxu2 %vm29_vm0, %v22_v9 }
  0x14   :  { %191 = vmatmul.msk.f32.gmra.mxu3 %vm29_vm0, %v26_v10 }
  0x15   :  { %179 = vmatmul.msk.f32.gmra.mxu0 %vm29_vm0, %v14_v11 }
  0x16   :  { %183 = vmatmul.msk.f32.gmra.mxu1 %vm29_vm0, %v18_v12 }
  0x1b   :  { %188 = vmatmul.msk.f32.gmra.mxu2 %vm29_vm0, %v23_v13 }
  0x1c   :  { %192 = vmatmul.msk.f32.gmra.mxu3 %vm29_vm0, %v27_v14 }
  0x1d   :  { %180 = vmatmul.msk.f32.gmra.mxu0 %vm29_vm0, %v15_v15 }
  0x1e   :  { %184 = vmatmul.msk.f32.gmra.mxu1 %vm29_vm0, %v19_v16 }
  0x82   :  { %v95_v17 = vpop.f32.mrf.mxu0 }
  0x83   :  { %v107_v18 = vpop.f32.mrf.mxu1  ;;  %143 = vst [vmem:[#allocation2] sm:$0xff] %v95_v17 }
  0x84   :  { %147 = vst [vmem:[#allocation2 + $0x20] sm:$0xff] %v107_v18 }
  0x86   :  { %v119_v19 = vpop.f32.mrf.mxu2 }
  0x87   :  { %v131_v20 = vpop.f32.mrf.mxu3  ;;  %151 = vst [vmem:[#allocation2 + $0x40] sm:$0xff] %v119_v19 }
  0x88   :  { %155 = vst [vmem:[#allocation2 + $0x60] sm:$0xff] %v131_v20 }
  0x8a   :  { %v98_v21 = vpop.f32.mrf.mxu0 }
  0x8b   :  { %v110_v22 = vpop.f32.mrf.mxu1  ;;  %144 = vst [vmem:[#allocation2 + $0x8] sm:$0xff] %v98_v21 }
  0x8c   :  { %148 = vst [vmem:[#allocation2 + $0x28] sm:$0xff] %v110_v22 }
  0x8e   :  { %v122_v23 = vpop.f32.mrf.mxu2 }
  0x8f   :  { %v134_v24 = vpop.f32.mrf.mxu3  ;;  %152 = vst [vmem:[#allocation2 + $0x48] sm:$0xff] %v122_v23 }
  0x90   :  { %156 = vst [vmem:[#allocation2 + $0x68] sm:$0xff] %v134_v24 }
  0x92   :  { %v101_v25 = vpop.f32.mrf.mxu0 }
  0x93   :  { %v113_v26 = vpop.f32.mrf.mxu1  ;;  %145 = vst [vmem:[#allocation2 + $0x10] sm:$0xff] %v101_v25 }
  0x94   :  { %149 = vst [vmem:[#allocation2 + $0x30] sm:$0xff] %v113_v26 }
  0x96   :  { %v125_v27 = vpop.f32.mrf.mxu2 }
  0x97   :  { %v137_v28 = vpop.f32.mrf.mxu3  ;;  %153 = vst [vmem:[#allocation2 + $0x50] sm:$0xff] %v125_v27 }
  0x98   :  { %157 = vst [vmem:[#allocation2 + $0x70] sm:$0xff] %v137_v28 }
  0x9a   :  { %v104_v29 = vpop.f32.mrf.mxu0 }
  0x9b   :  { %v116_v30 = vpop.f32.mrf.mxu1  ;;  %146 = vst [vmem:[#allocation2 + $0x18] sm:$0xff] %v104_v29 }
  0x9c   :  { %150 = vst [vmem:[#allocation2 + $0x38] sm:$0xff] %v116_v30 }
  0x9e   :  { %v128_v31 = vpop.f32.mrf.mxu2 }
  0x9f   :  { %v140_v32 = vpop.f32.mrf.mxu3  ;;  %154 = vst [vmem:[#allocation2 + $0x58] sm:$0xff] %v128_v31 }
  0xa0   :  { %158 = vst [vmem:[#allocation2 + $0x78] sm:$0xff] %v140_v32 }
  0xa1   :  { %171 = dma.vmem_to_hbm [thread:$0]  %s164_s14, 2048, %s166_s17, [#allocation3], %s226_s18, %s226_s18, %s227_s1  }
  0xa2   :  { %223 = dma.done.wait [#allocation3], 2048  }
  0xa3   :  { %224 = vsyncadd [#allocation3], 4294965248 }
  0xa4   :  { %176 = vsyncpa [#allocation3], 1 }

</bundles_post_ra>
